<compile_context>
chip_gen: v7x
topology: tpu7x:2x2x1
jax: 0.10.0
libtpu: 0.0.40
codegen_flags: <defaults>
</compile_context>

<pallas_src>
import functools

import jax
import jax.numpy as jnp
from jax.experimental import pallas as pl
from jax.experimental.pallas import tpu as pltpu

MARGIN = 2.0
EPS = 1e-6  # torch.nn.functional.pairwise_distance default eps


def _round_up(x: int, m: int) -> int:
    return (x + m - 1) // m * m


def _has_fast_bf16_valu() -> bool:
    """True on chips with a bf16 VALU (v6e / v7x); False on v5e and older."""
    try:
        kind = jax.devices()[0].device_kind.lower()
    except Exception:
        return False
    if "tpu" not in kind:
        return False
    return not any(v in kind for v in ("v2", "v3", "v4", "v5"))


def _contrastive_loss_kernel(x1_ref, x2_ref, w_ref, out_ref, acc_ref, *,
                             margin: float, true_b: int, tile_b: int,
                             tiles_per_part: int, need_mask: bool,
                             low_precision_diff: bool):
    c = pl.program_id(0)     # partition (parallel axis; megacore split on v7x)
    i = pl.program_id(1)     # batch tile within partition (arbitrary axis)

    @pl.when(i == 0)
    def _init():
        acc_ref[...] = jnp.zeros_like(acc_ref)

    x1 = x1_ref[...]                                   # (tile_b, D)
    x2 = x2_ref[...]                                   # (tile_b, D)
    if low_precision_diff:
        # bf16 subtract on packed vregs (v6e/v7x), single upcast afterwards.
        diff = (x1 - x2).astype(jnp.float32) + EPS
    else:
        diff = x1.astype(jnp.float32) - x2.astype(jnp.float32) + EPS

    sq_sum = jnp.sum(diff * diff, axis=-1, keepdims=True)   # (tile_b, 1)
    d = jnp.sqrt(sq_sum)                                     # only for the hinge
    hinge = jnp.maximum(margin - d, 0.0)

    w = w_ref[...].astype(jnp.float32)                       # (tile_b, 2) = [1-label, label]
    per_row = w[:, 0:1] * sq_sum + w[:, 1:2] * (hinge * hinge)   # (tile_b, 1)

    if need_mask:
        tile_idx = c * tiles_per_part + i          # logical (unclamped) tile index
        tile_end = (tile_idx + 1) * tile_b

        @pl.when(tile_end <= true_b)               # interior tile: no mask cost
        def _full():
            acc_ref[...] += jnp.sum(per_row, keepdims=True)

        @pl.when(tile_end > true_b)                # edge / duplicated tile: mask rows
        def _tail():
            row_ids = tile_idx * tile_b + jax.lax.broadcasted_iota(
                jnp.int32, (tile_b, 1), 0)
            acc_ref[...] += jnp.sum(
                jnp.where(row_ids < true_b, per_row, 0.0), keepdims=True)
    else:
        acc_ref[...] += jnp.sum(per_row, keepdims=True)

    @pl.when(i == tiles_per_part - 1)
    def _finalize():
        # Lane-dense (8,128) block per partition; wrapper picks element [0,0].
        out_ref[...] = jnp.broadcast_to(acc_ref[...], (1, 8, 128))


def contrastive_loss(output1, output2, label, *, margin=MARGIN, tile_b=None,
                     num_partitions=None, interpret=False):
    """output1, output2: (B, D) float (f32 or bf16); label: (B,) 0/1. Returns scalar f32."""
    assert output1.ndim == 2 and output1.shape == output2.shape
    B, D = output1.shape
    itemsize = max(jnp.dtype(output1.dtype).itemsize,
                   jnp.dtype(output2.dtype).itemsize)

    if tile_b is None:
        d_pad = _round_up(D, 128)   # lane padding in VMEM
        # ~40 MiB total pipelined footprint:
        #   2 pipeline buffers x (2 embedding blocks + weight block padded to
        #   128 bf16 lanes per row).
        per_row_bytes = 2 * (2 * d_pad * itemsize + 128 * 2)
        tile_b = (40 * 1024 * 1024) // per_row_bytes
        tile_b = max(8, min(tile_b, 16384))
    tile_b = _round_up(min(tile_b, _round_up(B, 8)), 8)

    total_tiles = -(-B // tile_b)
    if num_partitions is None:
        num_partitions = 2 if total_tiles >= 2 else 1
    num_partitions = max(1, min(num_partitions, total_tiles))
    tiles_per_part = -(-total_tiles // num_partitions)
    # Mask code is emitted only if some tile extends past B (partial last tile
    # or a duplicated tile from an uneven partition split).
    need_mask = (num_partitions * tiles_per_part * tile_b) != B

    # Precomputed weights [1-label, label]; bf16 is exact for 0/1 labels and
    # halves the 128-lane-padded VMEM block.  No padding of any array: garbage
    # rows of partial tiles are zeroed by the in-kernel mask.
    lab = label.reshape(-1).astype(jnp.float32)
    w = jnp.stack([1.0 - lab, lab], axis=-1).astype(jnp.bfloat16)   # (B, 2)

    low_precision_diff = (output1.dtype == jnp.bfloat16
                          and output2.dtype == jnp.bfloat16
                          and _has_fast_bf16_valu())

    def tile_index(c, i):
        # Clamp so duplicated tiles (uneven partition split) DMA a valid block;
        # their contribution is zeroed by the row mask.
        return (jnp.minimum(c * tiles_per_part + i, total_tiles - 1), 0)

    kernel = functools.partial(
        _contrastive_loss_kernel, margin=float(margin), true_b=B,
        tile_b=tile_b, tiles_per_part=tiles_per_part, need_mask=need_mask,
        low_precision_diff=low_precision_diff)

    out = pl.pallas_call(
        kernel,
        out_shape=jax.ShapeDtypeStruct((num_partitions, 8, 128), jnp.float32),
        grid=(num_partitions, tiles_per_part),
        in_specs=[
            pl.BlockSpec((tile_b, D), tile_index),
            pl.BlockSpec((tile_b, D), tile_index),
            pl.BlockSpec((tile_b, 2), tile_index),
        ],
        out_specs=pl.BlockSpec((1, 8, 128), lambda c, i: (c, 0, 0)),
        scratch_shapes=[pltpu.VMEM((1, 1), jnp.float32)],
        compiler_params=pltpu.CompilerParams(
            dimension_semantics=("parallel", "arbitrary"),
            vmem_limit_bytes=48 * 1024 * 1024),
        interpret=interpret,
    )(output1, output2, w)

    # Cross-partition reduction + mean in the wrapper (tiny).
    return jnp.sum(out[:, 0, 0]) / B


def _reference(output1, output2, label):
    # Pure-JAX reference mirroring the PyTorch module.
    diff = output1.astype(jnp.float32) - output2.astype(jnp.float32) + EPS
    d = jnp.sqrt(jnp.sum(diff * diff, axis=-1))
    hinge = jnp.maximum(MARGIN - d, 0.0)
    lab = label.astype(jnp.float32)
    return jnp.mean((1.0 - lab) * d ** 2 + lab * hinge ** 2)


if __name__ == "__main__":
    key = jax.random.PRNGKey(0)
    k1, k2, k3 = jax.random.split(key, 3)

    # Case 1: tile-aligned f32 batch, single tile, single partition.
    B, D = 8, 128
    o1 = jax.random.normal(k1, (B, D), dtype=jnp.float32)
    o2 = jax.random.normal(k2, (B, D), dtype=jnp.float32)
    lab = jax.random.bernoulli(k3, p=0.5, shape=(B,)).astype(jnp.float32)
    loss = contrastive_loss(o1, o2, lab)
    jax.block_until_ready(loss)
    ref = _reference(o1, o2, lab)
    assert jnp.allclose(loss, ref, rtol=1e-5, atol=1e-5), (loss, ref)

    # Case 2: non-multiple batch + bf16 streaming.  2 tiles -> 2 partitions,
    # partial last tile exercises the in-kernel row mask and (on v6e/v7x) the
    # packed-bf16 subtract path.
    k4, k5, k6 = jax.random.split(jax.random.PRNGKey(1), 3)
    B2, D2 = 10, 256
    p1 = jax.random.normal(k4, (B2, D2), dtype=jnp.bfloat16)
    p2 = jax.random.normal(k5, (B2, D2), dtype=jnp.bfloat16)
    lab2 = jax.random.bernoulli(k6, p=0.5, shape=(B2,)).astype(jnp.float32)
    loss2 = contrastive_loss(p1, p2, lab2, tile_b=8)
    jax.block_until_ready(loss2)
    ref2 = _reference(p1, p2, lab2)
    assert jnp.allclose(loss2, ref2, rtol=5e-3, atol=1e-3), (loss2, ref2)

    # Case 3: odd tile count (3 tiles over 2 partitions -> one clamped,
    # fully-masked duplicate tile) with small distances so the hinge is active.
    k7, k8, k9 = jax.random.split(jax.random.PRNGKey(2), 3)
    B3, D3 = 20, 128
    q1 = 0.05 * jax.random.normal(k7, (B3, D3), dtype=jnp.float32)
    q2 = 0.05 * jax.random.normal(k8, (B3, D3), dtype=jnp.float32)
    lab3 = jax.random.bernoulli(k9, p=0.5, shape=(B3,)).astype(jnp.float32)
    loss3 = contrastive_loss(q1, q2, lab3, tile_b=8, num_partitions=2)
    jax.block_until_ready(loss3)
    ref3 = _reference(q1, q2, lab3)
    assert jnp.allclose(loss3, ref3, rtol=1e-5, atol=1e-5), (loss3, ref3)

    print("KERNEL_OK")
</pallas_src>

<mosaic_0001>
module attributes {stable_mosaic.version = 11 : i64} {
  func.func @_contrastive_loss_kernel(%arg0: i32, %arg1: i32, %arg2: memref<8x128xf32, #tpu.memory_space<vmem>>, %arg3: memref<8x128xf32, #tpu.memory_space<vmem>>, %arg4: memref<8x2xbf16, #tpu.memory_space<vmem>>, %arg5: memref<1x8x128xf32, #tpu.memory_space<vmem>>, %arg6: memref<1x1xf32, #tpu.memory_space<vmem>>) attributes {dimension_semantics = [#tpu.dimension_semantics<parallel>, #tpu.dimension_semantics<arbitrary>], iteration_bounds = array<i64: 1, 1>, scalar_prefetch = 0 : i64, scratch_operands = 1 : i64, tpu.core_type = #tpu.core_type<tc>, window_params = [{transform_indices = @transform_0, window_bounds = array<i64: 8, 128>}, {transform_indices = @transform_1, window_bounds = array<i64: 8, 128>}, {transform_indices = @transform_2, window_bounds = array<i64: 8, 2>}, {transform_indices = @transform_3, window_bounds = array<i64: 1, 8, 128>}]} {
    %c0_i32 = arith.constant 0 : i32
    %0 = arith.cmpi eq, %arg1, %c0_i32 : i32
    %1 = arith.extui %0 : i1 to i32
    %c0_i32_0 = arith.constant 0 : i32
    %2 = arith.cmpi ne, %1, %c0_i32_0 : i32
    scf.if %2 {
      %cst_16 = arith.constant 0.000000e+00 : f32
      %35 = vector.broadcast %cst_16 : f32 to vector<1x1xf32>
      %c0_17 = arith.constant 0 : index
      %c0_18 = arith.constant 0 : index
      %36 = vector.load %arg6[%c0_17, %c0_18] : memref<1x1xf32, #tpu.memory_space<vmem>>, vector<1x1xf32>
      tpu.vector_store %arg6[%c0_17, %c0_18], %35 {strides = array<i32>} : memref<1x1xf32, #tpu.memory_space<vmem>>, vector<1x1xf32>,
    } else {
    }
    %c0 = arith.constant 0 : index
    %c0_1 = arith.constant 0 : index
    %3 = vector.load %arg2[%c0, %c0_1] : memref<8x128xf32, #tpu.memory_space<vmem>>, vector<8x128xf32>
    %c0_2 = arith.constant 0 : index
    %c0_3 = arith.constant 0 : index
    %4 = vector.load %arg3[%c0_2, %c0_3] : memref<8x128xf32, #tpu.memory_space<vmem>>, vector<8x128xf32>
    %5 = arith.subf %3, %4 : vector<8x128xf32>
    %cst = arith.constant 9.99999997E-7 : f32
    %6 = vector.broadcast %cst : f32 to vector<8x128xf32>
    %7 = arith.addf %5, %6 : vector<8x128xf32>
    %8 = arith.mulf %7, %7 : vector<8x128xf32>
    %cst_4 = arith.constant dense<0.000000e+00> : vector<8xf32>
    %9 = vector.multi_reduction <add>, %8, %cst_4 [1] : vector<8x128xf32> to vector<8xf32>
    %10 = vector.shape_cast %9 : vector<8xf32> to vector<8x1xf32>
    %11 = math.sqrt %10 : vector<8x1xf32>
    %cst_5 = arith.constant 2.000000e+00 : f32
    %12 = vector.broadcast %cst_5 : f32 to vector<8x1xf32>
    %13 = arith.subf %12, %11 : vector<8x1xf32>
    %cst_6 = arith.constant 0.000000e+00 : f32
    %14 = vector.broadcast %cst_6 : f32 to vector<8x1xf32>
    %15 = arith.maximumf %13, %14 : vector<8x1xf32>
    %c0_7 = arith.constant 0 : index
    %c0_8 = arith.constant 0 : index
    %16 = vector.load %arg4[%c0_7, %c0_8] : memref<8x2xbf16, #tpu.memory_space<vmem>>, vector<8x2xbf16>
    %17 = arith.extf %16 : vector<8x2xbf16> to vector<8x2xf32>
    %18 = vector.extract_strided_slice %17 {offsets = [0, 0], sizes = [8, 1], strides = [1, 1]} : vector<8x2xf32> to vector<8x1xf32>
    %19 = arith.mulf %18, %10 : vector<8x1xf32>
    %20 = vector.extract_strided_slice %17 {offsets = [0, 1], sizes = [8, 1], strides = [1, 1]} : vector<8x2xf32> to vector<8x1xf32>
    %21 = arith.mulf %15, %15 : vector<8x1xf32>
    %22 = arith.mulf %20, %21 : vector<8x1xf32>
    %23 = arith.addf %19, %22 : vector<8x1xf32>
    %c0_9 = arith.constant 0 : index
    %c0_10 = arith.constant 0 : index
    %24 = vector.load %arg6[%c0_9, %c0_10] : memref<1x1xf32, #tpu.memory_space<vmem>>, vector<1x1xf32>
    %25 = vector.shape_cast %23 : vector<8x1xf32> to vector<1x8x1xf32>
    %cst_11 = arith.constant dense<0.000000e+00> : vector<1xf32>
    %26 = vector.multi_reduction <add>, %25, %cst_11 [1, 2] : vector<1x8x1xf32> to vector<1xf32>
    %27 = vector.shape_cast %26 : vector<1xf32> to vector<1x1x1xf32>
    %28 = vector.extract %27[0, 0, 0] : f32 from vector<1x1x1xf32>
    %29 = vector.broadcast %28 : f32 to vector<1x1xf32>
    %30 = arith.addf %24, %29 : vector<1x1xf32>
    %c0_12 = arith.constant 0 : index
    %c0_13 = arith.constant 0 : index
    %31 = vector.load %arg6[%c0_12, %c0_13] : memref<1x1xf32, #tpu.memory_space<vmem>>, vector<1x1xf32>
    tpu.vector_store %arg6[%c0_12, %c0_13], %30 {strides = array<i32>} : memref<1x1xf32, #tpu.memory_space<vmem>>, vector<1x1xf32>,
    %c0_i32_14 = arith.constant 0 : i32
    %32 = arith.cmpi eq, %arg1, %c0_i32_14 : i32
    %33 = arith.extui %32 : i1 to i32
    %c0_i32_15 = arith.constant 0 : i32
    %34 = arith.cmpi ne, %33, %c0_i32_15 : i32
    scf.if %34 {
      %c0_16 = arith.constant 0 : index
      %c0_17 = arith.constant 0 : index
      %35 = vector.load %arg6[%c0_16, %c0_17] : memref<1x1xf32, #tpu.memory_space<vmem>>, vector<1x1xf32>
      %36 = vector.shape_cast %35 : vector<1x1xf32> to vector<1x1x1xf32>
      %37 = vector.broadcast %36 : vector<1x1x1xf32> to vector<1x8x128xf32>
      %c0_18 = arith.constant 0 : index
      %c0_19 = arith.constant 0 : index
      %c0_20 = arith.constant 0 : index
      %38 = vector.load %arg5[%c0_18, %c0_19, %c0_20] : memref<1x8x128xf32, #tpu.memory_space<vmem>>, vector<1x8x128xf32>
      tpu.vector_store %arg5[%c0_18, %c0_19, %c0_20], %37 {strides = array<i32>} : memref<1x8x128xf32, #tpu.memory_space<vmem>>, vector<1x8x128xf32>,
    } else {
    }
    return
  }
  func.func @transform_0(%arg0: i32, %arg1: i32) -> (i32, i32) {
    %c1_i32 = arith.constant 1 : i32
    %0 = arith.muli %arg0, %c1_i32 : i32
    %1 = arith.addi %0, %arg1 : i32
    %c0_i32 = arith.constant 0 : i32
    %2 = arith.minsi %1, %c0_i32 : i32
    %c0_i32_0 = arith.constant 0 : i32
    %c0_i32_1 = arith.constant 0 : i32
    return %2, %c0_i32_0 : i32, i32
  }
  func.func @transform_1(%arg0: i32, %arg1: i32) -> (i32, i32) {
    %c1_i32 = arith.constant 1 : i32
    %0 = arith.muli %arg0, %c1_i32 : i32
    %1 = arith.addi %0, %arg1 : i32
    %c0_i32 = arith.constant 0 : i32
    %2 = arith.minsi %1, %c0_i32 : i32
    %c0_i32_0 = arith.constant 0 : i32
    %c0_i32_1 = arith.constant 0 : i32
    return %2, %c0_i32_0 : i32, i32
  }
  func.func @transform_2(%arg0: i32, %arg1: i32) -> (i32, i32) {
    %c1_i32 = arith.constant 1 : i32
    %0 = arith.muli %arg0, %c1_i32 : i32
    %1 = arith.addi %0, %arg1 : i32
    %c0_i32 = arith.constant 0 : i32
    %2 = arith.minsi %1, %c0_i32 : i32
    %c0_i32_0 = arith.constant 0 : i32
    %c0_i32_1 = arith.constant 0 : i32
    return %2, %c0_i32_0 : i32, i32
  }
  func.func @transform_3(%arg0: i32, %arg1: i32) -> (i32, i32, i32) {
    %c0_i32 = arith.constant 0 : i32
    %c0_i32_0 = arith.constant 0 : i32
    %c0_i32_1 = arith.constant 0 : i32
    return %arg0, %c0_i32, %c0_i32_0 : i32, i32, i32
  }
}

</mosaic_0001>

<bundles_post_ra>
// kernel: tpu_custom_call.1
= control target key start
LH: loop header
LB: loop body
LE: loop exit
PB: predicated region body
PF: predicated region fallthrough
CT: control target
= control target key end

     0   :  { %8 = vsyncpa [#allocation4], 0  ;;  %s297_s0 = inlined_call_operand.hbm [shape: f32[8,128], index: 0, kind: input, shape index: {}]   ;;  %s298_s1 = inlined_call_operand.vmem [shape: f32[8,128], index: 1, kind: input, shape index: {}]   ;;  %s299_s2 = inlined_call_operand.vmem [shape: bf16[8,2], index: 2, kind: input, shape index: {}]   ;;  %s300_s3 = inlined_call_operand.hbm [shape: f32[1,8,128], index: 3, kind: output, shape index: {}]  }
   0x1   :  { %9 = vsyncpa [#allocation5], 0  ;;  %s240_s12 = smov [#allocation3]   ;;  %s192_s16 = scalar_lea.hbm %s297_s0, 128 }
   0x2   :  { %s21_s13 = sshll.u32 %s240_s12, 4  ;;  %p193_p0 = scmp.ne.s32.totalorder %s297_s0, %s192_s16  ;;  %s22_s13 = int_to_ptr.vmem [resolvable:$true] %s21_s13 }
   0x3   :  { %p196_p1 = scmp.lt.u32.totalorder %s192_s16, %s297_s0 }
   0x5   :  { %p198_p2 = pnand %p196_p1, %p193_p0 }
   0x7   :  { %201 = shalt.err (!%p198_p2)
}
   0x8   :  { %s202_s21 = scalar_lea.vmem %s22_s13, 128  ;;  %p207_p4 = scmp.lt.s32.totalorder %s22_s13, %s22_s13 }
   0x9   :  { %p203_p3 = scmp.ne.s32.totalorder %s22_s13, %s202_s21  ;;  %p208_p5 = scmp.lt.s32.totalorder %s202_s21, %s202_s21 }
   0xb   :  { %p209_p6 = por %p208_p5, %p207_p4 }
   0xd   :  { %p210_p7 = pnand %p209_p6, %p203_p3 }
   0xf   :  { %213 = shalt.err (!%p210_p7)
}
  0x10   :  { %24 = dma.hbm_to_vmem [thread:$0]  %s297_s0, 128, %s22_s13, [#allocation4]  }
  0x11   :  { %236 = dma.done.wait [#allocation4], 128  }
  0x12   :  { %237 = vsyncadd [#allocation4], 4294967168  ;;  %v95_v0 = vld [vmem:[#allocation3] sm:$0xff]  ;;  %vm122_vm2 = vcmask 7168   ;;  %vm93_vm3 = vcmask 0   ;;  %v242_v21 = vmov 0.0  }
  0x13   :  { %v96_v1 = vld [vmem:[%s298_s1] sm:$0xff]  ;;  %s241_s1 = smov 127   ;;  %94 = vst.msk [vmem:[#allocation2] sm:$0x1] %vm93_vm3, %v242_v21  ;;  %v243_v22 = vmov 0   ;;  %s244_s27 = smov [#allocation6]  }
  0x14   :  { %v97_v2 = vsub.f32 %v95_v0, %v96_v1  ;;  %v111_v12 = vld [vmem:[%s299_s2] sm:$0xf]  ;;  %188 = vset.pattern.permute.xlu1 %v243_v22  ;;  %189 = vset.pattern.permute.xlu0 %v243_v22  ;;  %s157_s28 = sshll.u32 %s244_s27, 4  ;;  %s158_s28 = int_to_ptr.vmem [resolvable:$true] %s157_s28 }
  0x15   :  { %v112_v14 = vunpack.c.l.bf16 %v111_v12  ;;  %s214_s29 = scalar_lea.vmem %s158_s28, 128  ;;  %p219_p9 = scmp.lt.s32.totalorder %s158_s28, %s158_s28 }
  0x16   :  { %v98_v3 = vadd.f32 1e-06, %v97_v2  ;;  %p215_p8 = scmp.ne.s32.totalorder %s158_s28, %s214_s29  ;;  %p220_p10 = scmp.lt.s32.totalorder %s214_s29, %s214_s29 }
  0x18   :  { %v99_v4 = vmul.f32 %v98_v3, %v98_v3  ;;  %p221_p11 = por %p220_p10, %p219_p9 }
  0x1a   :  { %100 = vadd.xlane.f32.xlu0 %v99_v4  ;;  %v121_v30 = vld [vmem:[#allocation2] sm:$0x1]  ;;  %p222_p12 = pnand %p221_p11, %p215_p8 }
  0xa7   :  { %v101_v5 = vpop.xlane.xlu0 %100 }
  0xa8   :  { %190 = vrsqrt.f32 %v101_v5  ;;  %vm104_vm0 = vcmp.eq.f32.partialorder %v101_v5, inf  ;;  %v107_v8 = vand.u32 2147483648, %v101_v5  ;;  %vm106_vm1 = vcmp.eq.f32.partialorder %v101_v5, 0.0 }
  0xa9   :  { %v113_v17 = vmul.f32 %v112_v14, %v101_v5 }
  0xb2   :  { %v191_v6 = vpop.eup %190 }
  0xb3   :  { %v103_v7 = vmul.f32 %v191_v6, %v101_v5 }
  0xb5   :  { %v105_v9 = vsel %vm104_vm0, %v101_v5, %v103_v7 }
  0xb6   :  { %v108_v10 = vsel %vm106_vm1, %v107_v8, %v105_v9 }
  0xb7   :  { %v109_v11 = vsub.f32 2.0, %v108_v10 }
  0xb9   :  { %v110_v13 = vmax.f32 %v109_v11, 0.0 }
  0xbb   :  { %v114_v15 = vmul.f32 %v110_v13, %v110_v13 }
  0xbd   :  { %v115_v16 = vmul.f32 %v114_v15, %v112_v14 }
  0xbf   :  { %117 = vrot.lane.b32.xlu0 %v115_v16, %s241_s1 }
 0x131   :  { %v118_v18 = vpop.permute.xlu0 %117 }
 0x132   :  { %v120_v19 = vadd.f32 %v118_v18, %v113_v17 }
 0x134   :  { %v123_v20 = vsel %vm122_vm2, %v120_v19, 0.0 }
 0x135   :  { %124 = vadd.xlane.f32.xlu1 %v123_v20 }
 0x1c2   :  { %v125_v23 = vpop.xlane.xlu1 %124 }
 0x1c3   :  { %v126_v24 = vrot.slane %v125_v23, 4 }
 0x1c5   :  { %v127_v25 = vadd.f32 %v126_v24, %v125_v23 }
 0x1c7   :  { %v128_v26 = vrot.slane %v127_v25, 2 }
 0x1c9   :  { %v129_v27 = vadd.f32 %v128_v26, %v127_v25 }
 0x1cb   :  { %v130_v28 = vrot.slane %v129_v27, 1 }
 0x1cd   :  { %v131_v29 = vadd.f32 %v130_v28, %v129_v27 }
 0x1cf   :  { %181 = vpush %v131_v29 }
 0x200   :  { %s182_s2 = spop %181 }
 0x201   :  { %v133_v31 = vstv %s182_s2 }
 0x202   :  { %v134_v32 = vadd.f32 %v133_v31, %v121_v30 }
 0x204   :  { %136 = vst.msk [vmem:[#allocation2] sm:$0x1] %vm93_vm3, %v134_v32 }
 0x20b   :  { %v180_v33 = vld [vmem:[#allocation2] ss:$0 sm:$0xff] }
 0x20c   :  { %147 = vperm.xlu1 %188, %v180_v33  }
 0x28b   :  { %v148_v34 = vpop.permute.xlu1 %147 }
 0x28c   :  { %150 = vst [vmem:[#allocation6] sm:$0xff] %v148_v34 }
 0x28d   :  { %225 = shalt.err (!%p222_p12)
}
 0x28e   :  { %s226_s5 = scalar_lea.hbm %s300_s3, 128 }
 0x28f   :  { %p227_p13 = scmp.ne.s32.totalorder %s300_s3, %s226_s5  ;;  %p230_p0 = scmp.lt.u32.totalorder %s226_s5, %s300_s3 }
 0x291   :  { %p232_p1 = pnand %p230_p0, %p227_p13 }
 0x293   :  { %235 = shalt.err (!%p232_p1)
}
 0x294   :  { %160 = dma.vmem_to_hbm [thread:$0]  %s158_s28, 128, %s300_s3, [#allocation5]  }
 0x295   :  { %238 = dma.done.wait [#allocation5], 128  }
 0x296   :  { %239 = vsyncadd [#allocation5], 4294967168 }
 0x297   :  { %164 = vsyncpa [#allocation4], 1 }
 0x298   :  { %165 = vsyncpa [#allocation5], 1 }

</bundles_post_ra>
